<compile_context>
chip_gen: v7x
topology: tpu7x:2x2x1
jax: 0.10.0
libtpu: 0.0.40
codegen_flags: <defaults>
</compile_context>

<pallas_src>
import jax
import jax.numpy as jnp
from jax.experimental import pallas as pl
from jax.experimental.pallas import tpu as pltpu


def _prompt_cat_shared_ctx_kernel(prefix_ref, ctx_ref, suffix_ref, out_ref):
    """ctx shared across classes: ctx_ref is (n_ctx, D)."""
    blk_cls = out_ref.shape[0]
    n_ctx, d = ctx_ref.shape
    # [prefix | ctx (broadcast over classes) | suffix] along the sequence axis.
    out_ref[:, 0:1, :] = prefix_ref[...]
    ctx = ctx_ref[...]
    out_ref[:, 1:1 + n_ctx, :] = jnp.broadcast_to(ctx[None, :, :], (blk_cls, n_ctx, d))
    out_ref[:, 1 + n_ctx:, :] = suffix_ref[...]


def _prompt_cat_class_ctx_kernel(prefix_ref, ctx_ref, suffix_ref, out_ref):
    """class-specific ctx: ctx_ref is (blk_cls, n_ctx, D)."""
    n_ctx = ctx_ref.shape[1]
    out_ref[:, 0:1, :] = prefix_ref[...]
    out_ref[:, 1:1 + n_ctx, :] = ctx_ref[...]
    out_ref[:, 1 + n_ctx:, :] = suffix_ref[...]


def prompt_learner_forward(ctx, token_prefix, token_suffix,
                           class_token_position="end", block_cls=None):
    """Pallas implementation of PromptLearner.forward().

    ctx          : (n_ctx, D) or (n_cls, n_ctx, D)
    token_prefix : (n_cls, 1, D)
    token_suffix : (n_cls, S, D)
    returns      : (n_cls, 1 + n_ctx + S, D)
    """
    if class_token_position != "end":
        # TODO(synk): 'middle'/'front' positions need per-class name_len-dependent
        # sequence layouts; not implemented as a kernel here.
        raise NotImplementedError("only class_token_position='end' is implemented")

    n_cls, _, d = token_prefix.shape
    suffix_len = token_suffix.shape[1]
    class_specific = (ctx.ndim == 3)
    n_ctx = ctx.shape[-2]
    total_len = 1 + n_ctx + suffix_len

    # Tile only on the class dim; one grid step at small sizes.  For very large
    # n_cls (VMEM pressure, esp. v7x's 64 MiB), pass a divisor block_cls.
    if block_cls is None:
        block_cls = n_cls
    assert n_cls % block_cls == 0, "block_cls must divide n_cls"
    grid = (n_cls // block_cls,)

    if class_specific:
        kernel = _prompt_cat_class_ctx_kernel
        ctx_spec = pl.BlockSpec((block_cls, n_ctx, d), lambda i: (i, 0, 0))
    else:
        kernel = _prompt_cat_shared_ctx_kernel
        ctx_spec = pl.BlockSpec((n_ctx, d), lambda i: (0, 0))  # same block every step

    return pl.pallas_call(
        kernel,
        out_shape=jax.ShapeDtypeStruct((n_cls, total_len, d), token_prefix.dtype),
        grid=grid,
        in_specs=[
            pl.BlockSpec((block_cls, 1, d), lambda i: (i, 0, 0)),
            ctx_spec,
            pl.BlockSpec((block_cls, suffix_len, d), lambda i: (i, 0, 0)),
        ],
        out_specs=pl.BlockSpec((block_cls, total_len, d), lambda i: (i, 0, 0)),
        compiler_params=pltpu.CompilerParams(dimension_semantics=("parallel",)),
    )(token_prefix, ctx, token_suffix)


def prompt_learner_forward_ref(ctx, token_prefix, token_suffix):
    """Pure-JAX reference mirroring the PyTorch forward (position == 'end')."""
    if ctx.ndim == 2:
        ctx = jnp.broadcast_to(ctx[None, :, :],
                               (token_prefix.shape[0],) + ctx.shape)
    return jnp.concatenate([token_prefix, ctx, token_suffix], axis=1)


if __name__ == "__main__":
    key = jax.random.PRNGKey(0)
    k1, k2, k3, k4 = jax.random.split(key, 4)

    # Small shapes consistent with the module: n_cls classes, n_ctx learned
    # context tokens, context_length total tokens, ctx_dim embedding width.
    n_cls, n_ctx, ctx_dim, context_length = 4, 4, 128, 16
    suffix_len = context_length - 1 - n_ctx  # 11

    token_prefix = jax.random.normal(k1, (n_cls, 1, ctx_dim), jnp.float32)
    token_suffix = jax.random.normal(k2, (n_cls, suffix_len, ctx_dim), jnp.float32)
    ctx_shared = 0.02 * jax.random.normal(k3, (n_ctx, ctx_dim), jnp.float32)
    ctx_class = 0.02 * jax.random.normal(k4, (n_cls, n_ctx, ctx_dim), jnp.float32)

    # Shared-context path (ctx.dim() == 2 in the PyTorch module).
    out_shared = jax.block_until_ready(
        prompt_learner_forward(ctx_shared, token_prefix, token_suffix))
    # Class-specific-context path (ctx.dim() == 3).
    out_class = jax.block_until_ready(
        prompt_learner_forward(ctx_class, token_prefix, token_suffix))

    ref_shared = prompt_learner_forward_ref(ctx_shared, token_prefix, token_suffix)
    ref_class = prompt_learner_forward_ref(ctx_class, token_prefix, token_suffix)

    assert out_shared.shape == (n_cls, context_length, ctx_dim)
    assert out_class.shape == (n_cls, context_length, ctx_dim)
    assert jnp.allclose(out_shared, ref_shared), "shared-ctx mismatch"
    assert jnp.allclose(out_class, ref_class), "class-specific-ctx mismatch"
    print("KERNEL_OK")
</pallas_src>

<mosaic_0001>
module attributes {stable_mosaic.version = 11 : i64} {
  func.func @_prompt_cat_shared_ctx_kernel(%arg0: i32, %arg1: memref<4x1x128xf32, #tpu.memory_space<vmem>>, %arg2: memref<4x128xf32, #tpu.memory_space<vmem>>, %arg3: memref<4x11x128xf32, #tpu.memory_space<vmem>>, %arg4: memref<4x16x128xf32, #tpu.memory_space<vmem>>) attributes {dimension_semantics = [#tpu.dimension_semantics<parallel>], iteration_bounds = array<i64: 1>, scalar_prefetch = 0 : i64, scratch_operands = 0 : i64, tpu.core_type = #tpu.core_type<tc>, window_params = [{transform_indices = @transform_0, window_bounds = array<i64: 4, 1, 128>}, {pipeline_mode = #tpu.pipeline_mode<synchronous>, transform_indices = @transform_1, window_bounds = array<i64: 4, 128>}, {transform_indices = @transform_2, window_bounds = array<i64: 4, 11, 128>}, {transform_indices = @transform_3, window_bounds = array<i64: 4, 16, 128>}]} {
    %c0 = arith.constant 0 : index
    %c0_0 = arith.constant 0 : index
    %c0_1 = arith.constant 0 : index
    %0 = vector.load %arg1[%c0, %c0_0, %c0_1] : memref<4x1x128xf32, #tpu.memory_space<vmem>>, vector<4x1x128xf32>
    %c0_2 = arith.constant 0 : index
    %c0_3 = arith.constant 0 : index
    %c0_4 = arith.constant 0 : index
    %1 = vector.load %arg4[%c0_2, %c0_3, %c0_4] : memref<4x16x128xf32, #tpu.memory_space<vmem>>, vector<4x1x128xf32>
    tpu.vector_store %arg4[%c0_2, %c0_3, %c0_4], %0 {strides = array<i32>} : memref<4x16x128xf32, #tpu.memory_space<vmem>>, vector<4x1x128xf32>,
    %c0_5 = arith.constant 0 : index
    %c0_6 = arith.constant 0 : index
    %2 = vector.load %arg2[%c0_5, %c0_6] : memref<4x128xf32, #tpu.memory_space<vmem>>, vector<4x128xf32>
    %3 = vector.shape_cast %2 : vector<4x128xf32> to vector<1x4x128xf32>
    %4 = vector.shape_cast %3 : vector<1x4x128xf32> to vector<1x4x128xf32>
    %5 = vector.broadcast %4 : vector<1x4x128xf32> to vector<4x4x128xf32>
    %c0_7 = arith.constant 0 : index
    %c1 = arith.constant 1 : index
    %c0_8 = arith.constant 0 : index
    %6 = vector.load %arg4[%c0_7, %c1, %c0_8] : memref<4x16x128xf32, #tpu.memory_space<vmem>>, vector<4x4x128xf32>
    tpu.vector_store %arg4[%c0_7, %c1, %c0_8], %5 {strides = array<i32>} : memref<4x16x128xf32, #tpu.memory_space<vmem>>, vector<4x4x128xf32>,
    %c0_9 = arith.constant 0 : index
    %c0_10 = arith.constant 0 : index
    %c0_11 = arith.constant 0 : index
    %7 = vector.load %arg3[%c0_9, %c0_10, %c0_11] : memref<4x11x128xf32, #tpu.memory_space<vmem>>, vector<4x11x128xf32>
    %c0_12 = arith.constant 0 : index
    %c5 = arith.constant 5 : index
    %c0_13 = arith.constant 0 : index
    %8 = vector.load %arg4[%c0_12, %c5, %c0_13] : memref<4x16x128xf32, #tpu.memory_space<vmem>>, vector<4x11x128xf32>
    tpu.vector_store %arg4[%c0_12, %c5, %c0_13], %7 {strides = array<i32>} : memref<4x16x128xf32, #tpu.memory_space<vmem>>, vector<4x11x128xf32>,
    return
  }
  func.func @transform_0(%arg0: i32) -> (i32, i32, i32) {
    %c0_i32 = arith.constant 0 : i32
    %c0_i32_0 = arith.constant 0 : i32
    %c0_i32_1 = arith.constant 0 : i32
    return %arg0, %c0_i32, %c0_i32_0 : i32, i32, i32
  }
  func.func @transform_1(%arg0: i32) -> (i32, i32) {
    %c0_i32 = arith.constant 0 : i32
    %c0_i32_0 = arith.constant 0 : i32
    %c0_i32_1 = arith.constant 0 : i32
    return %c0_i32, %c0_i32_0 : i32, i32
  }
  func.func @transform_2(%arg0: i32) -> (i32, i32, i32) {
    %c0_i32 = arith.constant 0 : i32
    %c0_i32_0 = arith.constant 0 : i32
    %c0_i32_1 = arith.constant 0 : i32
    return %arg0, %c0_i32, %c0_i32_0 : i32, i32, i32
  }
  func.func @transform_3(%arg0: i32) -> (i32, i32, i32) {
    %c0_i32 = arith.constant 0 : i32
    %c0_i32_0 = arith.constant 0 : i32
    %c0_i32_1 = arith.constant 0 : i32
    return %arg0, %c0_i32, %c0_i32_0 : i32, i32, i32
  }
}

</mosaic_0001>

<bundles_post_ra>
// kernel: tpu_custom_call.1
= control target key start
LH: loop header
LB: loop body
LE: loop exit
PB: predicated region body
PF: predicated region fallthrough
CT: control target
= control target key end

     0   :  { %s87_s28 = smov [#allocation2]   ;;  %s161_s0 = inlined_call_operand.vmem [shape: f32[4,1,128], index: 0, kind: input, shape index: {}]   ;;  %s162_s1 = inlined_call_operand.vmem [shape: f32[4,128], index: 1, kind: input, shape index: {}]   ;;  %s163_s2 = inlined_call_operand.vmem [shape: f32[4,11,128], index: 2, kind: input, shape index: {}]   ;;  %s164_s3 = inlined_call_operand.hbm [shape: f32[4,16,128], index: 3, kind: output, shape index: {}]  }
   0x1   :  { %v15_v0 = vld [vmem:[%s161_s0] sm:$0x1]  ;;  %v16_v1 = vld [vmem:[%s161_s0 + $0x1] sm:$0x1]  ;;  %v17_v2 = vld [vmem:[%s161_s0 + $0x2] sm:$0x1] }
   0x2   :  { %19 = vst [vmem:[#allocation2] sm:$0x1] %v15_v0  ;;  %20 = vst [vmem:[#allocation2 + $0x10] sm:$0x1] %v16_v1  ;;  %v18_v3 = vld [vmem:[%s161_s0 + $0x3] sm:$0x1] }
   0x3   :  { %21 = vst [vmem:[#allocation2 + $0x20] sm:$0x1] %v17_v2  ;;  %v23_v4 = vld [vmem:[%s162_s1] sm:$0xf]  ;;  %22 = vst [vmem:[#allocation2 + $0x30] sm:$0x1] %v18_v3 }
   0x4   :  { %v28_v5 = vld [vmem:[%s163_s2] sm:$0xff]  ;;  %24 = vst [vmem:[#allocation2 + $0x1] sm:$0xf] %v23_v4  ;;  %25 = vst [vmem:[#allocation2 + $0x11] sm:$0xf] %v23_v4  ;;  %v30_v7 = vld [vmem:[%s163_s2 + $0x10] sm:$0xff] }
   0x5   :  { %26 = vst [vmem:[#allocation2 + $0x21] sm:$0xf] %v23_v4  ;;  %27 = vst [vmem:[#allocation2 + $0x31] sm:$0xf] %v23_v4  ;;  %v29_v6 = vld [vmem:[%s163_s2 + $0x8] sm:$0x7] }
   0x6   :  { %36 = vst [vmem:[#allocation2 + $0x5] sm:$0xff] %v28_v5  ;;  %v31_v8 = vld [vmem:[%s163_s2 + $0x18] sm:$0x7]  ;;  %s49_s29 = sshll.u32 %s87_s28, 4  ;;  %37 = vst [vmem:[#allocation2 + $0xd] sm:$0x7] %v29_v6  ;;  %s50_s29 = int_to_ptr.vmem [resolvable:$true] %s49_s29 }
   0x7   :  { %38 = vst [vmem:[#allocation2 + $0x15] sm:$0xff] %v30_v7  ;;  %39 = vst [vmem:[#allocation2 + $0x1d] sm:$0x7] %v31_v8  ;;  %v32_v9 = vld [vmem:[%s163_s2 + $0x20] sm:$0xff]  ;;  %v33_v10 = vld [vmem:[%s163_s2 + $0x28] sm:$0x7] }
   0x8   :  { %v34_v11 = vld [vmem:[%s163_s2 + $0x30] sm:$0xff]  ;;  %40 = vst [vmem:[#allocation2 + $0x25] sm:$0xff] %v32_v9  ;;  %41 = vst [vmem:[#allocation2 + $0x2d] sm:$0x7] %v33_v10  ;;  %v35_v12 = vld [vmem:[%s163_s2 + $0x38] sm:$0x7] }
   0x9   :  { %42 = vst [vmem:[#allocation2 + $0x35] sm:$0xff] %v34_v11 }
   0xa   :  { %8 = vsyncpa [#allocation3], 0  ;;  %43 = vst [vmem:[#allocation2 + $0x3d] sm:$0x7] %v35_v12  ;;  %s63_s11 = scalar_lea.vmem %s50_s29, 1024  ;;  %p68_p1 = scmp.lt.s32.totalorder %s50_s29, %s50_s29 }
   0xb   :  { %p64_p0 = scmp.ne.s32.totalorder %s50_s29, %s63_s11  ;;  %p69_p2 = scmp.lt.s32.totalorder %s63_s11, %s63_s11 }
   0xd   :  { %p70_p3 = por %p69_p2, %p68_p1 }
   0xf   :  { %p71_p4 = pnand %p70_p3, %p64_p0 }
  0x11   :  { %74 = shalt.err (!%p71_p4)
}
  0x12   :  { %s75_s14 = scalar_lea.hbm %s164_s3, 1024 }
  0x13   :  { %p76_p5 = scmp.ne.s32.totalorder %s164_s3, %s75_s14  ;;  %p79_p6 = scmp.lt.u32.totalorder %s75_s14, %s164_s3 }
  0x15   :  { %p81_p7 = pnand %p79_p6, %p76_p5 }
  0x17   :  { %84 = shalt.err (!%p81_p7)
}
  0x18   :  { %s88_s2 = smov 128   ;;  %s89_s19 = smov 8  }
  0x19   :  { %55 = dma.vmem_to_hbm [thread:$0]  %s50_s29, 1024, %s164_s3, [#allocation3], %s88_s2, %s88_s2, %s89_s19  }
  0x1a   :  { %85 = dma.done.wait [#allocation3], 1024  }
  0x1b   :  { %86 = vsyncadd [#allocation3], 4294966272 }
  0x1c   :  { %59 = vsyncpa [#allocation3], 1 }

</bundles_post_ra>
